<compile_context>
chip_gen: v7x
topology: tpu7x:2x2x1
jax: 0.10.0
libtpu: 0.0.40
codegen_flags: <defaults>
</compile_context>

<pallas_src>
import functools

import jax
import jax.numpy as jnp
from jax.experimental import pallas as pl
from jax.experimental.pallas import tpu as pltpu


# ---------------------------------------------------------------------------
# pl.Buffered(1) support probe (constant-index blocks are DMA'd once, so
# double-buffering them only doubles their VMEM footprint).
# ---------------------------------------------------------------------------
@functools.lru_cache(maxsize=None)
def _buffered_ok() -> bool:
    def _copy(x_ref, o_ref):
        o_ref[...] = x_ref[...]

    try:
        f = pl.pallas_call(
            _copy,
            grid=(2,),
            in_specs=[pl.BlockSpec((8, 128), lambda i: (0, 0),
                                   pipeline_mode=pl.Buffered(1))],
            out_specs=pl.BlockSpec((8, 128), lambda i: (0, 0)),
            out_shape=jax.ShapeDtypeStruct((8, 128), jnp.float32),
        )
        jax.block_until_ready(f(jnp.zeros((8, 128), jnp.float32)))
        return True
    except Exception:
        return False


def _resident(block_shape):
    """Spec for a read-only block with a constant index_map: fetched once,
    VMEM-resident across the grid, single-buffered when supported."""
    idx = lambda *_: (0,) * len(block_shape)
    if _buffered_ok():
        return pl.BlockSpec(block_shape, idx, pipeline_mode=pl.Buffered(1))
    return pl.BlockSpec(block_shape, idx)


# ---------------------------------------------------------------------------
# Phase A: embedding gather + relu + batched layer-0 input gates
# ---------------------------------------------------------------------------
def _embed_gates_kernel(toks_ref,    # scalar-prefetch (SMEM): (T,) int32 token ids
                        emb_ref,     # (O, H)  f32  embedding table (resident)
                        wih_ref,     # (H, 3H) bf16 W_ih^T (resident)
                        bih_ref,     # (1, 3H) f32  b_ih
                        gi0_ref,     # out: (T, 3H) f32 layer-0 input gates
                        x_scr):      # scratch: (T, H) f32 gathered embeddings
    seq_len = x_scr.shape[0]

    # Exact f32 embedding-row gather driven by SMEM token ids.
    def gather(i, carry):
        tok = toks_ref[i]
        x_scr[pl.ds(i, 1), :] = emb_ref[pl.ds(tok, 1), :]
        return carry

    jax.lax.fori_loop(0, seq_len, gather, 0, unroll=True)

    # relu, then ONE batched (T,H)x(H,3H) MXU matmul: bf16 x bf16 -> f32.
    x = jnp.maximum(x_scr[...], 0.0).astype(jnp.bfloat16)
    gi0_ref[...] = (
        jnp.dot(x, wih_ref[...], preferred_element_type=jnp.float32)
        + bih_ref[...]
    )


# ---------------------------------------------------------------------------
# Phase B: sequential GRU recurrence (one grid step per timestep)
# ---------------------------------------------------------------------------
def _gru_recurrence_kernel(gi0_ref,   # (1, 3H) f32  precomputed layer-0 input gates (step t)
                           h0_ref,    # (1, H)  f32  initial hidden state
                           whh_ref,   # (H, 3H) bf16 W_hh^T  (resident)
                           bhh_ref,   # (1, 3H) f32  b_hh
                           wih_ref,   # (H, 3H) bf16 W_ih^T  (only read when n_layers > 1)
                           bih_ref,   # (1, 3H) f32  b_ih    (only read when n_layers > 1)
                           hall_ref,  # out: (1, H) f32  hidden state for step t
                           hout_ref,  # out: (1, H) f32  final hidden (VMEM-resident carry)
                           *, n_layers, hidden_size):
    H = hidden_size
    t = pl.program_id(0)

    # hout_ref has a constant index_map -> stays VMEM-resident across all T
    # grid steps and doubles as the recurrence carry.
    @pl.when(t == 0)
    def _():
        hout_ref[...] = h0_ref[...]

    h = hout_ref[...]
    for layer in range(n_layers):
        if layer == 0:
            gi = gi0_ref[...]               # relu(emb) @ W_ih^T + b_ih (phase A)
        else:
            x = jnp.maximum(h, 0.0).astype(jnp.bfloat16)
            gi = (jnp.dot(x, wih_ref[...], preferred_element_type=jnp.float32)
                  + bih_ref[...])
        gh = (jnp.dot(h.astype(jnp.bfloat16), whh_ref[...],
                      preferred_element_type=jnp.float32)
              + bhh_ref[...])
        # PyTorch GRU gate order (r, z, n); slicing the (1,3H) results is a
        # cheap vreg select.  All elementwise gate math stays f32.
        r = jax.nn.sigmoid(gi[:, 0:H] + gh[:, 0:H])
        z = jax.nn.sigmoid(gi[:, H:2 * H] + gh[:, H:2 * H])
        n = jnp.tanh(gi[:, 2 * H:3 * H] + r * gh[:, 2 * H:3 * H])
        h = (1.0 - z) * n + z * h

    hall_ref[...] = h
    hout_ref[...] = h


# ---------------------------------------------------------------------------
# Phase C: batched vocab projection + log-softmax (M = T)
# ---------------------------------------------------------------------------
def _project_logsoftmax_kernel(hall_ref,   # (T, H) f32 all hidden states
                               wout_ref,   # (H, O) bf16 W_out^T (resident)
                               bout_ref,   # (1, O) f32
                               logp_ref):  # out: (T, O) f32 log-probs
    h = hall_ref[...].astype(jnp.bfloat16)
    logits = (jnp.dot(h, wout_ref[...], preferred_element_type=jnp.float32)
              + bout_ref[...])
    m = jnp.max(logits, axis=-1, keepdims=True)
    lse = m + jnp.log(jnp.sum(jnp.exp(logits - m), axis=-1, keepdims=True))
    logp_ref[...] = logits - lse


# ---------------------------------------------------------------------------
# Parameters
# ---------------------------------------------------------------------------
def init_params(key, hidden_size, output_size):
    """Raw parameters in PyTorch layout (f32).  Matmul weights are rounded
    through bf16 once so the bf16 kernel weights and the reference use
    bit-identical values."""
    ks = jax.random.split(key, 7)
    s = 1.0 / jnp.sqrt(hidden_size)
    rt = lambda w: w.astype(jnp.bfloat16).astype(jnp.float32)
    H, O = hidden_size, output_size
    return {
        "embedding": jax.random.normal(ks[0], (O, H), jnp.float32),
        "w_ih": rt(jax.random.uniform(ks[1], (3 * H, H), jnp.float32, -s, s)),
        "w_hh": rt(jax.random.uniform(ks[2], (3 * H, H), jnp.float32, -s, s)),
        "b_ih": jax.random.uniform(ks[3], (3 * H,), jnp.float32, -s, s),
        "b_hh": jax.random.uniform(ks[4], (3 * H,), jnp.float32, -s, s),
        "w_out": rt(jax.random.uniform(ks[5], (O, H), jnp.float32, -s, s)),
        "b_out": jax.random.uniform(ks[6], (O,), jnp.float32, -s, s),
    }


def prepare_params(raw, weight_dtype=jnp.bfloat16):
    """One-time layout conversion: transpose matmul weights (no per-call
    HBM->HBM transposes), keep gates fused (H, 3H), cast matmul weights to
    bf16, keep biases / embedding f32."""
    H = raw["w_hh"].shape[1]
    return {
        "embedding": raw["embedding"].astype(jnp.float32),        # (O, H)
        "w_ih_t": raw["w_ih"].T.astype(weight_dtype),              # (H, 3H)
        "w_hh_t": raw["w_hh"].T.astype(weight_dtype),              # (H, 3H)
        "b_ih": raw["b_ih"].reshape(1, 3 * H).astype(jnp.float32),
        "b_hh": raw["b_hh"].reshape(1, 3 * H).astype(jnp.float32),
        "w_out_t": raw["w_out"].T.astype(weight_dtype),            # (H, O)
        "b_out": raw["b_out"].reshape(1, -1).astype(jnp.float32),  # (1, O)
    }


# ---------------------------------------------------------------------------
# Wrappers
# ---------------------------------------------------------------------------
def decoder_rnn_decode(tokens, hidden, prep, n_layers=1):
    """Teacher-forced T-step decode.  tokens: int (T,); hidden: f32 (1,1,H).
    Returns (log_probs (T, O) f32, hidden (1, 1, H) f32)."""
    tokens = tokens.reshape(-1).astype(jnp.int32)
    T = int(tokens.shape[0])
    O, H = prep["embedding"].shape
    h0 = hidden.reshape(1, H).astype(jnp.float32)

    seq_params = pltpu.CompilerParams(dimension_semantics=("arbitrary",))
    # NOTE: at realistic sizes, add vmem_limit_bytes (~100 MB) here on
    # v5e/v6e to keep bf16 w_out VMEM-resident; on v7x tile/stream w_out.

    # ---- Phase A: embedding gather + relu + batched layer-0 input gates ----
    gi0 = pl.pallas_call(
        _embed_gates_kernel,
        grid_spec=pltpu.PrefetchScalarGridSpec(
            num_scalar_prefetch=1,
            grid=(1,),
            in_specs=[
                _resident((O, H)),           # embedding table
                _resident((H, 3 * H)),       # W_ih^T (bf16)
                _resident((1, 3 * H)),       # b_ih
            ],
            out_specs=pl.BlockSpec((T, 3 * H), lambda *_: (0, 0)),
            scratch_shapes=[pltpu.VMEM((T, H), jnp.float32)],
        ),
        out_shape=jax.ShapeDtypeStruct((T, 3 * H), jnp.float32),
        compiler_params=seq_params,
    )(tokens, prep["embedding"], prep["w_ih_t"], prep["b_ih"])

    # ---- Phase B: sequential GRU recurrence (grid = timesteps) ----
    gru_kernel = functools.partial(
        _gru_recurrence_kernel, n_layers=n_layers, hidden_size=H)
    h_all, h_last = pl.pallas_call(
        gru_kernel,
        grid_spec=pltpu.PrefetchScalarGridSpec(
            num_scalar_prefetch=0,
            grid=(T,),
            in_specs=[
                pl.BlockSpec((1, 3 * H), lambda t: (t, 0)),   # gi0[t]
                pl.BlockSpec((1, H), lambda t: (0, 0)),       # h0
                _resident((H, 3 * H)),                        # W_hh^T (bf16)
                _resident((1, 3 * H)),                        # b_hh
                _resident((H, 3 * H)),                        # W_ih^T (used iff n_layers > 1)
                _resident((1, 3 * H)),                        # b_ih   (used iff n_layers > 1)
            ],
            out_specs=[
                pl.BlockSpec((1, H), lambda t: (t, 0)),       # per-step hidden
                pl.BlockSpec((1, H), lambda t: (0, 0)),       # final hidden (carry)
            ],
        ),
        out_shape=(jax.ShapeDtypeStruct((T, H), jnp.float32),
                   jax.ShapeDtypeStruct((1, H), jnp.float32)),
        compiler_params=pltpu.CompilerParams(
            # the timestep axis carries the recurrent hidden state
            dimension_semantics=("arbitrary",)),
    )(gi0, h0, prep["w_hh_t"], prep["b_hh"], prep["w_ih_t"], prep["b_ih"])

    # ---- Phase C: batched vocab projection + log-softmax (M = T) ----
    log_probs = pl.pallas_call(
        _project_logsoftmax_kernel,
        grid_spec=pltpu.PrefetchScalarGridSpec(
            num_scalar_prefetch=0,
            grid=(1,),
            in_specs=[
                pl.BlockSpec((T, H), lambda *_: (0, 0)),
                _resident((H, O)),           # W_out^T (bf16)
                _resident((1, O)),           # b_out
            ],
            out_specs=pl.BlockSpec((T, O), lambda *_: (0, 0)),
        ),
        out_shape=jax.ShapeDtypeStruct((T, O), jnp.float32),
        compiler_params=seq_params,
    )(h_all, prep["w_out_t"], prep["b_out"])

    return log_probs, h_last.reshape(1, 1, H)


def decoder_rnn_forward(token, hidden, prep, n_layers=1):
    """Single decoder step, exactly matching DecoderRNN.forward(input, hidden)."""
    lp, h = decoder_rnn_decode(token.reshape(1), hidden, prep, n_layers=n_layers)
    return lp, h


def decoder_rnn_ref(tokens, hidden, raw, n_layers=1):
    """Pure-JAX reference mirroring the PyTorch forward per token, with the
    kernels' precision policy (bf16 matmul operands, f32 accumulation, f32
    elementwise gate / softmax math)."""
    H = raw["w_hh"].shape[1]
    w_ih_t = raw["w_ih"].T.astype(jnp.bfloat16)
    w_hh_t = raw["w_hh"].T.astype(jnp.bfloat16)
    w_out_t = raw["w_out"].T.astype(jnp.bfloat16)
    b_ih = raw["b_ih"].reshape(1, -1)
    b_hh = raw["b_hh"].reshape(1, -1)
    b_out = raw["b_out"].reshape(1, -1)
    dot = lambda a, b: jnp.dot(a.astype(jnp.bfloat16), b,
                               preferred_element_type=jnp.float32)

    h = hidden.reshape(1, H).astype(jnp.float32)
    outs = []
    for t in range(tokens.shape[0]):
        x = raw["embedding"][tokens[t]].reshape(1, H)
        for _ in range(n_layers):
            x = jnp.maximum(x, 0.0)
            gi = dot(x, w_ih_t) + b_ih
            gh = dot(h, w_hh_t) + b_hh
            r = jax.nn.sigmoid(gi[:, 0:H] + gh[:, 0:H])
            z = jax.nn.sigmoid(gi[:, H:2 * H] + gh[:, H:2 * H])
            n = jnp.tanh(gi[:, 2 * H:] + r * gh[:, 2 * H:])
            h = (1.0 - z) * n + z * h
            x = h
        outs.append(jax.nn.log_softmax(dot(x, w_out_t) + b_out, axis=-1))
    return jnp.concatenate(outs, axis=0), h.reshape(1, 1, H)


if __name__ == "__main__":
    HIDDEN = 32
    OUTPUT = 16    # vocab size
    T = 6          # decode steps

    key = jax.random.PRNGKey(0)
    raw = init_params(key, HIDDEN, OUTPUT)
    prep = prepare_params(raw)   # one-time layout conversion

    tokens = jax.random.randint(jax.random.PRNGKey(1), (T,), 0, OUTPUT, dtype=jnp.int32)
    hidden = jnp.zeros((1, 1, HIDDEN), dtype=jnp.float32)   # initHidden()

    # 1) single step -- identical to the module's forward(input, hidden)
    lp1, h1 = decoder_rnn_forward(tokens[:1], hidden, prep, n_layers=1)
    jax.block_until_ready((lp1, h1))
    ref_lp1, ref_h1 = decoder_rnn_ref(tokens[:1], hidden, raw, n_layers=1)
    assert lp1.shape == (1, OUTPUT) and h1.shape == (1, 1, HIDDEN)
    assert jnp.allclose(lp1, ref_lp1, atol=1e-3, rtol=1e-3)
    assert jnp.allclose(h1, ref_h1, atol=1e-3, rtol=1e-3)

    # 2) T-step decode, n_layers=1 (module default)
    lp, h_new = decoder_rnn_decode(tokens, hidden, prep, n_layers=1)
    jax.block_until_ready((lp, h_new))
    ref_lp, ref_h = decoder_rnn_ref(tokens, hidden, raw, n_layers=1)
    assert lp.shape == (T, OUTPUT) and h_new.shape == (1, 1, HIDDEN)
    assert jnp.allclose(lp, ref_lp, atol=1e-3, rtol=1e-3)
    assert jnp.allclose(h_new, ref_h, atol=1e-3, rtol=1e-3)

    # 3) T-step decode, n_layers=2 (exercises the in-recurrence W_ih path)
    lp2, h_new2 = decoder_rnn_decode(tokens, hidden, prep, n_layers=2)
    jax.block_until_ready((lp2, h_new2))
    ref_lp2, ref_h2 = decoder_rnn_ref(tokens, hidden, raw, n_layers=2)
    assert jnp.allclose(lp2, ref_lp2, atol=1e-3, rtol=1e-3)
    assert jnp.allclose(h_new2, ref_h2, atol=1e-3, rtol=1e-3)

    print("KERNEL_OK")
</pallas_src>

<mosaic_0001>
module attributes {stable_mosaic.version = 11 : i64} {
  func.func @_copy(%arg0: i32, %arg1: memref<8x128xf32, #tpu.memory_space<vmem>>, %arg2: memref<8x128xf32, #tpu.memory_space<vmem>>) attributes {dimension_semantics = [#tpu.dimension_semantics<arbitrary>], iteration_bounds = array<i64: 2>, scalar_prefetch = 0 : i64, scratch_operands = 0 : i64, tpu.core_type = #tpu.core_type<tc>, window_params = [{pipeline_mode = #tpu.pipeline_mode<synchronous>, transform_indices = @transform_0, window_bounds = array<i64: 8, 128>}, {pipeline_mode = #tpu.pipeline_mode<synchronous>, transform_indices = @transform_1, window_bounds = array<i64: 8, 128>}]} {
    %c0 = arith.constant 0 : index
    %c0_0 = arith.constant 0 : index
    %0 = vector.load %arg1[%c0, %c0_0] : memref<8x128xf32, #tpu.memory_space<vmem>>, vector<8x128xf32>
    %c0_1 = arith.constant 0 : index
    %c0_2 = arith.constant 0 : index
    %1 = vector.load %arg2[%c0_1, %c0_2] : memref<8x128xf32, #tpu.memory_space<vmem>>, vector<8x128xf32>
    tpu.vector_store %arg2[%c0_1, %c0_2], %0 {strides = array<i32>} : memref<8x128xf32, #tpu.memory_space<vmem>>, vector<8x128xf32>,
    return
  }
  func.func @transform_0(%arg0: i32) -> (i32, i32) {
    %c0_i32 = arith.constant 0 : i32
    %c0_i32_0 = arith.constant 0 : i32
    %c0_i32_1 = arith.constant 0 : i32
    return %c0_i32, %c0_i32_0 : i32, i32
  }
  func.func @transform_1(%arg0: i32) -> (i32, i32) {
    %c0_i32 = arith.constant 0 : i32
    %c0_i32_0 = arith.constant 0 : i32
    %c0_i32_1 = arith.constant 0 : i32
    return %c0_i32, %c0_i32_0 : i32, i32
  }
}

module attributes {stable_mosaic.version = 11 : i64} {
  func.func @_embed_gates_kernel(%arg0: i32, %arg1: memref<1xi32, #tpu.memory_space<smem>>, %arg2: memref<16x32xf32, #tpu.memory_space<vmem>>, %arg3: memref<32x96xbf16, #tpu.memory_space<vmem>>, %arg4: memref<1x96xf32, #tpu.memory_space<vmem>>, %arg5: memref<1x96xf32, #tpu.memory_space<vmem>>, %arg6: memref<1x32xf32, #tpu.memory_space<vmem>>) attributes {dimension_semantics = [#tpu.dimension_semantics<arbitrary>], iteration_bounds = array<i64: 1>, scalar_prefetch = 1 : i64, scratch_operands = 1 : i64, tpu.core_type = #tpu.core_type<tc>, window_params = [{pipeline_mode = #tpu.pipeline_mode<synchronous>, transform_indices = @transform_0, window_bounds = array<i64: 16, 32>}, {pipeline_mode = #tpu.pipeline_mode<synchronous>, transform_indices = @transform_1, window_bounds = array<i64: 32, 96>}, {pipeline_mode = #tpu.pipeline_mode<synchronous>, transform_indices = @transform_2, window_bounds = array<i64: 1, 96>}, {pipeline_mode = #tpu.pipeline_mode<synchronous>, transform_indices = @transform_3, window_bounds = array<i64: 1, 96>}]} {
    %c0_i32 = arith.constant 0 : i32
    %0 = arith.index_cast %c0_i32 : i32 to index
    %1 = memref.load %arg1[%0] : memref<1xi32, #tpu.memory_space<smem>>
    %2 = arith.index_cast %1 : i32 to index
    %c0 = arith.constant 0 : index
    %3 = vector.load %arg2[%2, %c0] : memref<16x32xf32, #tpu.memory_space<vmem>>, vector<1x32xf32>
    %4 = arith.index_cast %c0_i32 : i32 to index
    %c0_0 = arith.constant 0 : index
    %5 = vector.load %arg6[%4, %c0_0] : memref<1x32xf32, #tpu.memory_space<vmem>>, vector<1x32xf32>
    tpu.vector_store %arg6[%4, %c0_0], %3 {strides = array<i32>} : memref<1x32xf32, #tpu.memory_space<vmem>>, vector<1x32xf32>,
    %c1_i32 = arith.constant 1 : i32
    %c0_1 = arith.constant 0 : index
    %c0_2 = arith.constant 0 : index
    %6 = vector.load %arg6[%c0_1, %c0_2] : memref<1x32xf32, #tpu.memory_space<vmem>>, vector<1x32xf32>
    %cst = arith.constant 0.000000e+00 : f32
    %7 = vector.broadcast %cst : f32 to vector<1x32xf32>
    %8 = arith.maximumf %6, %7 : vector<1x32xf32>
    %9 = arith.truncf %8 : vector<1x32xf32> to vector<1x32xbf16>
    %c0_3 = arith.constant 0 : index
    %c0_4 = arith.constant 0 : index
    %10 = vector.load %arg3[%c0_3, %c0_4] : memref<32x96xbf16, #tpu.memory_space<vmem>>, vector<32x96xbf16>
    %cst_5 = arith.constant dense<0.000000e+00> : vector<1x96xf32>
    %11 = tpu.matmul %9, %10, %cst_5 {dimension_numbers = #tpu.dot_dimension_numbers<[1], [0], [0], [1], [0, 0, 1, 1], [], []>} : vector<1x32xbf16>, vector<32x96xbf16>, vector<1x96xf32> -> vector<1x96xf32>
    %c0_6 = arith.constant 0 : index
    %c0_7 = arith.constant 0 : index
    %12 = vector.load %arg4[%c0_6, %c0_7] : memref<1x96xf32, #tpu.memory_space<vmem>>, vector<1x96xf32>
    %13 = arith.addf %11, %12 : vector<1x96xf32>
    %c0_8 = arith.constant 0 : index
    %c0_9 = arith.constant 0 : index
    %14 = vector.load %arg5[%c0_8, %c0_9] : memref<1x96xf32, #tpu.memory_space<vmem>>, vector<1x96xf32>
    tpu.vector_store %arg5[%c0_8, %c0_9], %13 {strides = array<i32>} : memref<1x96xf32, #tpu.memory_space<vmem>>, vector<1x96xf32>,
    return
  }
  func.func @transform_0(%arg0: i32, %arg1: memref<1xi32, #tpu.memory_space<smem>>) -> (i32, i32) {
    %c0_i32 = arith.constant 0 : i32
    %c0_i32_0 = arith.constant 0 : i32
    %c0_i32_1 = arith.constant 0 : i32
    return %c0_i32, %c0_i32_0 : i32, i32
  }
  func.func @transform_1(%arg0: i32, %arg1: memref<1xi32, #tpu.memory_space<smem>>) -> (i32, i32) {
    %c0_i32 = arith.constant 0 : i32
    %c0_i32_0 = arith.constant 0 : i32
    %c0_i32_1 = arith.constant 0 : i32
    return %c0_i32, %c0_i32_0 : i32, i32
  }
  func.func @transform_2(%arg0: i32, %arg1: memref<1xi32, #tpu.memory_space<smem>>) -> (i32, i32) {
    %c0_i32 = arith.constant 0 : i32
    %c0_i32_0 = arith.constant 0 : i32
    %c0_i32_1 = arith.constant 0 : i32
    return %c0_i32, %c0_i32_0 : i32, i32
  }
  func.func @transform_3(%arg0: i32, %arg1: memref<1xi32, #tpu.memory_space<smem>>) -> (i32, i32) {
    %c0_i32 = arith.constant 0 : i32
    %c0_i32_0 = arith.constant 0 : i32
    %c0_i32_1 = arith.constant 0 : i32
    return %c0_i32, %c0_i32_0 : i32, i32
  }
}

</mosaic_0001>

<bundles_post_ra>
// kernel: tpu_custom_call.1
= control target key start
LH: loop header
LB: loop body
LE: loop exit
PB: predicated region body
PF: predicated region fallthrough
CT: control target
= control target key end

     0   :  { %6 = vsyncpa [#allocation3], 0  ;;  %s340_s0 = inlined_call_operand.hbm [shape: f32[8,128], index: 0, kind: input, shape index: {}]   ;;  %s341_s1 = inlined_call_operand.hbm [shape: f32[8,128], index: 1, kind: output, shape index: {}]  }
   0x1   :  { %7 = vsyncpa [#allocation4], 0  ;;  %s261_s6 = smov 0  }
   0x2 LB: > { %s144_s7 = sadd.s32 4294967295, %s247_s6   ;;  %p145_p0 = scmp.ge.s32.totalorder %s247_s6, 1  ;;  %s247_s6 = sphi %s261_s6, %s13_s6  }
   0x3   : > { %p60_p1 = scmp.lt.s32.totalorder %s247_s6, 3  ;;  %p275_p3 = scmp.eq.s32.totalorder %s144_s7, 0 }
   0x4   : > { %s249_s10 = smov [#allocation2]   ;;  %s179_s15 = scalar_lea.hbm %s340_s0, 128 }
   0x5   : > { %p269_p2 = pnand %p145_p0, %p60_p1  ;;  %s73_s11 = sshll.u32 %s249_s10, 4  ;;  %s74_s11 = int_to_ptr.vmem [resolvable:$true] %s73_s11 }
   0x6   : > { %s346_s9 = scalar_select %p275_p3, 1, 0 }
   0x7   : > { %s345_s8 = scalar_select %p269_p2, 1, 0 }
   0x8   : > { %p161_p4 = pneg %p269_p2  ;;  %p180_p6 = scmp.ne.s32.totalorder %s340_s0, %s179_s15 }
   0x9   : > { %p186_p10 = scmp.lt.u32.totalorder %s179_s15, %s340_s0 }
   0xa   : > { %p283_p5 = pnand %p275_p3, %p161_p4 }
   0xc   : > { %p181_p7 = pneg %p283_p5 }
   0xe   : > { %p182_p8 = pnand %p181_p7, %p180_p6 }
  0x10   : > { %p183_p9 = pneg %p182_p8 }
  0x12   : > { %p188_p11 = pnand %p186_p10, %p183_p9 }
  0x14   : > { %191 = shalt.err (!%p188_p11)
}
  0x15   : > { %s192_s20 = scalar_lea.vmem %s74_s11, 128  ;;  %p200_p1 = scmp.lt.s32.totalorder %s74_s11, %s74_s11 }
  0x16   : > { %p193_p12 = scmp.ne.s32.totalorder %s74_s11, %s192_s20  ;;  %p201_p4 = scmp.lt.s32.totalorder %s192_s20, %s192_s20 }
  0x18   : > { %p195_p13 = pnand %p193_p12, %p181_p7  ;;  %p202_p3 = por %p201_p4, %p200_p1 }
  0x1a   : > { %p196_p0 = pneg %p195_p13 }
  0x1c   : > { %p203_p2 = pnand %p202_p3, %p196_p0 }
  0x1e   : > { %206 = shalt.err (!%p203_p2)
}
  0x1f   : > { %164 = dma.hbm_to_vmem [thread:$0]  (!%p283_p5), %s340_s0, 128, %s74_s11, [#allocation3]  }
  0x20   : > { %p348_p6 = scmp.ne.s32.totalorder %s345_s8, 0 }
  0x21   : > { %p349_p8 = scmp.ne.s32.totalorder (!%p348_p6), %s346_s9, 0 }
  0x22   : > { %86 = sbr.rel (%p348_p6) target bundleno = 67 (0x43), region = 24 }
  0x29   : > { %238 = dma.done.wait (%p349_p8), [#allocation3], 128  }
  0x2a   : > { %240 = vsyncadd (%p349_p8), [#allocation3], 4294967168  ;;  %s250_s23 = smov [#allocation5]   ;;  %p311_p2 = scmp.eq.s32.totalorder %s144_s7, 1  ;;  %v96_v0 = vld [vmem:[#allocation2] sm:$0xff] }
  0x2b   : > { %s105_s24 = sshll.u32 %s250_s23, 4  ;;  %97 = vst [vmem:[#allocation5] sm:$0xff] %v96_v0  ;;  %s106_s24 = int_to_ptr.vmem [resolvable:$true] %s105_s24 }
  0x2c   : > { %s207_s26 = scalar_lea.vmem %s106_s24, 128  ;;  %p214_p9 = scmp.lt.s32.totalorder %s106_s24, %s106_s24 }
  0x2d   : > { %p208_p3 = scmp.ne.s32.totalorder %s106_s24, %s207_s26  ;;  %p215_p10 = scmp.lt.s32.totalorder %s207_s26, %s207_s26 }
  0x2f   : > { %p209_p5 = pnand %p208_p3, %p311_p2  ;;  %p216_p11 = por %p215_p10, %p214_p9 }
  0x31   : > { %p210_p7 = pneg %p209_p5 }
  0x33   : > { %p217_p12 = pnand %p216_p11, %p210_p7 }
  0x35   : > { %220 = shalt.err (!%p217_p12)
}
  0x36   : > { %s221_s29 = scalar_lea.hbm %s341_s1, 128 }
  0x37   : > { %p222_p13 = scmp.ne.s32.totalorder %s341_s1, %s221_s29  ;;  %p227_p4 = scmp.lt.u32.totalorder %s221_s29, %s341_s1 }
  0x39   : > { %p223_p0 = pnand %p222_p13, %p311_p2 }
  0x3b   : > { %p224_p1 = pneg %p223_p0 }
  0x3d   : > { %p229_p6 = pnand %p227_p4, %p224_p1 }
  0x3f   : > { %232 = shalt.err (!%p229_p6)
}
  0x40   : > { %158 = dma.vmem_to_hbm [thread:$0]  (%p311_p2), %s106_s24, 128, %s341_s1, [#allocation4]  }
  0x41   : > { %242 = dma.done.wait (%p311_p2), [#allocation4], 128  }
  0x42   : > { %244 = vsyncadd (%p311_p2), [#allocation4], 4294967168 }
  0x43 PF: > { %s13_s6 = sadd.s32 1, %s247_s6  }
  0x44   : > { %p10_p8 = scmp.ge.s32.totalorder %s13_s6, 4  }
  0x46   :  { %12 = sbr.rel (!%p10_p8) target bundleno = 2 (0x2), region = 53 }
  0x4d   :  { %118 = vsyncpa [#allocation3], 1 }
  0x4e   :  { %120 = vsyncpa [#allocation3 + $0x1], 1 }
  0x4f   :  { %121 = vsyncpa [#allocation4], 1 }
  0x50   :  { %123 = vsyncpa [#allocation4 + $0x1], 1 }

// kernel: tpu_custom_call.1
= control target key start
LH: loop header
LB: loop body
LE: loop exit
PB: predicated region body
PF: predicated region fallthrough
CT: control target
= control target key end

     0   :  { %10 = vsyncpa [#allocation6], 0  ;;  %s307_s0 = inlined_call_operand.<no memory space> [shape: s32[1], index: 0, kind: input, shape index: {}]   ;;  %s308_s1 = inlined_call_operand.hbm [shape: f32[16,32], index: 1, kind: input, shape index: {}]   ;;  %s309_s2 = inlined_call_operand.hbm [shape: bf16[32,96], index: 2, kind: input, shape index: {}]   ;;  %s310_s3 = inlined_call_operand.vmem [shape: f32[1,96], index: 3, kind: input, shape index: {}]   ;;  %s311_s4 = inlined_call_operand.hbm [shape: f32[1,96], index: 4, kind: output, shape index: {}]  }
   0x1   :  { %11 = vsyncpa [#allocation9], 0 }
   0x2   :  { %12 = vsyncpa [#allocation7], 0  ;;  %s231_s15 = smov [#allocation5]   ;;  %s159_s19 = scalar_lea.hbm %s308_s1, 256 }
   0x3   :  { %s18_s16 = sshll.u32 %s231_s15, 4  ;;  %p160_p0 = scmp.ne.s32.totalorder %s308_s1, %s159_s19  ;;  %s19_s16 = int_to_ptr.vmem [resolvable:$true] %s18_s16 }
   0x4   :  { %p163_p1 = scmp.lt.u32.totalorder %s159_s19, %s308_s1 }
   0x6   :  { %p165_p2 = pnand %p163_p1, %p160_p0 }
   0x8   :  { %168 = shalt.err (!%p165_p2)
}
   0x9   :  { %s169_s24 = scalar_lea.vmem %s19_s16, 256  ;;  %p174_p4 = scmp.lt.s32.totalorder %s19_s16, %s19_s16 }
   0xa   :  { %p170_p3 = scmp.ne.s32.totalorder %s19_s16, %s169_s24  ;;  %p175_p5 = scmp.lt.s32.totalorder %s169_s24, %s169_s24 }
   0xc   :  { %p176_p6 = por %p175_p5, %p174_p4 }
   0xe   :  { %p177_p7 = pnand %p176_p6, %p170_p3 }
  0x10   :  { %180 = shalt.err (!%p177_p7)
}
  0x11   :  { %s232_s25 = smov 128   ;;  %s233_s26 = smov 8  }
  0x12   :  { %24 = dma.hbm_to_vmem [thread:$0]  %s308_s1, 256, %s19_s16, [#allocation6], %s232_s25, %s232_s25, %s233_s26  }
  0x13   :  { %s234_s29 = smov [#allocation8]   ;;  %s181_s7 = scalar_lea.hbm %s309_s2, 256 }
  0x14   :  { %s30_s30 = sshll.u32 %s234_s29, 4  ;;  %p182_p8 = scmp.ne.s32.totalorder %s309_s2, %s181_s7  ;;  %s31_s30 = int_to_ptr.vmem [resolvable:$true] %s30_s30 }
  0x15   :  { %p185_p9 = scmp.lt.u32.totalorder %s181_s7, %s309_s2 }
  0x17   :  { %p187_p10 = pnand %p185_p9, %p182_p8 }
  0x19   :  { %190 = shalt.err (!%p187_p10)
}
  0x1a   :  { %s191_s12 = scalar_lea.vmem %s31_s30, 256  ;;  %p196_p12 = scmp.lt.s32.totalorder %s31_s30, %s31_s30 }
  0x1b   :  { %p192_p11 = scmp.ne.s32.totalorder %s31_s30, %s191_s12  ;;  %p197_p13 = scmp.lt.s32.totalorder %s191_s12, %s191_s12 }
  0x1d   :  { %p198_p0 = por %p197_p13, %p196_p12 }
  0x1f   :  { %p199_p1 = pnand %p198_p0, %p192_p11 }
  0x21   :  { %202 = shalt.err (!%p199_p1)
}
  0x22   :  { %s235_s1 = smov 64   ;;  %s236_s13 = smov 4  }
  0x23   :  { %36 = dma.hbm_to_vmem [thread:$0]  %s309_s2, 256, %s31_s30, [#allocation9], %s235_s1, %s235_s1, %s236_s13  }
  0x24   :  { %225 = dma.done.wait [#allocation6], 256  }
  0x25   :  { %226 = vsyncadd [#allocation6], 4294967040 }
  0x26   :  { %227 = dma.done.wait [#allocation9], 256  }
  0x27   :  { %228 = vsyncadd [#allocation9], 4294967040  ;;  %v237_v0 = vmov 0.0   ;;  %vm238_vm0 = vmmov 0   ;;  %vm49_vm1 = vcmask 253952   ;;  %s47_s18 = scalar_lea.vmem [#allocation5], %s307_s0 }
  0x28   :  { %140 = vmatprep.subr.bf16.mxu0 %v237_v0  ;;  %144 = vmatprep.mubr.msk.bf16.mxu0 %vm238_vm0, %v237_v0  ;;  %v48_v1 = vld [vmem:[%s47_s18] sm:$0x1]  ;;  %v157_v2 = vld [vmem:[#allocation8] sm:$0xff]   ;;  %vm71_vm2 = vcmask 261120   ;;  %s239_s20 = smov [#allocation10]   ;;  %vm115_vm3 = vcmask 778240  }
  0x29   :  { %50 = vst.msk [vmem:[#allocation2] sm:$0x1] %vm49_vm1, %v48_v1  ;;  %141 = vmatpush3.bf16.msra.mxu0 %v157_v2  ;;  %v158_v3 = vld [vmem:[#allocation8 + $0x8] sm:$0xff]   ;;  %s123_s21 = sshll.u32 %s239_s20, 4  ;;  %s124_s21 = int_to_ptr.vmem [resolvable:$true] %s123_s21 }
  0x2a   :  { %142 = vmatprep.subr.bf16.mxu0 %v237_v0  ;;  %v58_v7 = vld [vmem:[%s310_s3] sm:$0x1]  ;;  %s203_s0 = scalar_lea.vmem %s124_s21, 16  ;;  %s207_s22 = scalar_lea.vmem %s124_s21, 32 }
  0x2b   :  { %p204_p2 = scmp.ne.s32.totalorder %s124_s21, %s203_s0  ;;  %p208_p3 = scmp.lt.s32.totalorder %s124_s21, %s124_s21 }
  0x2c   :  { %p209_p4 = scmp.lt.s32.totalorder %s207_s22, %s203_s0 }
  0x2d   :  { %143 = vmatpush3.bf16.msra.mxu0 %v158_v3 }
  0x2e   :  { %p210_p5 = por %p209_p4, %p208_p3 }
  0x30   :  { %v51_v4 = vld [vmem:[#allocation2] sm:$0x1]  ;;  %p211_p6 = pnand %p210_p5, %p204_p2 }
  0x31   :  { %v52_v5 = vmax.f32 %v51_v4, 0.0 }
  0x33   :  { %v53_v6 = vpack.c.bf16 %v52_v5, %v52_v5 }
  0x35   :  { %145 = vmatmul.mubr.msk.bf16.vlgmr.msra.gmra.mrb[0].mxu0 %vm71_vm2, %v53_v6 }
 0x108   :  { %v109_v8 = vpop.f32.mrb[0].mxu0 }
 0x109   :  { %v110_v9 = vadd.f32 %v109_v8, %v58_v7  ;;  %v146_v10 = vpop.f32.mrb[1].mxu0 }
 0x10a   :  { %v112_v11 = vpop.f32.mrb[2].mxu0 }
 0x10b   :  { %v147_v12 = vpop.f32.mrb[3].mxu0  ;;  %116 = vst.msk [vmem:[#allocation10] sm:$0x1] %vm115_vm3, %v110_v9 }
 0x10c   :  { %214 = shalt.err (!%p211_p6)
}
 0x10d   :  { %s215_s24 = scalar_lea.hbm %s311_s4, 16 }
 0x10e   :  { %p216_p7 = scmp.ne.s32.totalorder %s311_s4, %s215_s24  ;;  %p219_p8 = scmp.lt.u32.totalorder %s215_s24, %s311_s4 }
 0x110   :  { %p221_p9 = pnand %p219_p8, %p216_p7 }
 0x112   :  { %224 = shalt.err (!%p221_p9)
}
 0x113   :  { %126 = dma.vmem_to_hbm [thread:$0]  %s124_s21, 16, %s311_s4, [#allocation7]  }
 0x114   :  { %229 = dma.done.wait [#allocation7], 16  }
 0x115   :  { %230 = vsyncadd [#allocation7], 4294967280 }
 0x116   :  { %130 = vsyncpa [#allocation6], 1 }
 0x117   :  { %131 = vsyncpa [#allocation9], 1 }
 0x118   :  { %132 = vsyncpa [#allocation7], 1 }

</bundles_post_ra>
